<compile_context>
chip_gen: v6e
topology: v6e:2x2x1
jax: 0.10.0
libtpu: 0.0.40
codegen_flags: <defaults>
</compile_context>

<pallas_src>
import functools

import jax
import jax.numpy as jnp
from jax.experimental import pallas as pl
from jax.experimental.pallas import tpu as pltpu

KH = KW = 4
STRIDE = 2
PAD = 1
EPS = 1e-5
LEAKY_SLOPE = 0.2


def _block_unet1_kernel(w_ref, mask_ref, x_ref, o_ref, *, bn, n_imgs, wq, s):
    # w_ref   : (4, C4, Cb)    2x2-tap weights, Cb = Cout block (lane-dense)
    # mask_ref: (Rz, 1) f32    1.0 on valid output rows, 0.0 on the wq==Wo junk column
    # x_ref   : (NB, Rp, C4)   activated, space-to-depth'd, zero-padded input rows
    # o_ref   : (NB, Rz, Cb)   compute_dtype, lane-dense output (rows = (ho, wq) grid)
    rz = o_ref.shape[1]
    shifts = (0, 1, wq, wq + 1)          # row offsets of the four 2x2 taps
    inv_s = 1.0 / s
    mask = mask_ref[...]                 # (Rz, 1) f32, resident (fetched once)

    def one_image(b):
        # 4x4 / stride-2 conv == four accumulated MXU matmuls over sublane-shifted
        # *Ref* views (no value re-layouts); f32 accumulation on the MXU.
        z = jnp.dot(x_ref[b, pl.ds(shifts[0], rz), :], w_ref[0],
                    preferred_element_type=jnp.float32)
        for t in range(1, 4):
            z = z + jnp.dot(x_ref[b, pl.ds(shifts[t], rz), :], w_ref[t],
                            preferred_element_type=jnp.float32)

        if bn:
            # InstanceNorm2d: per-(image, channel) stats over the S valid spatial
            # positions (biased variance, eps=1e-5, no affine).  Single pass over z.
            zm = z * mask                                            # junk rows -> 0
            mean = jnp.sum(zm, axis=0, keepdims=True) * inv_s        # (1, Cb) f32
            var = jnp.sum(zm * zm, axis=0, keepdims=True) * inv_s - mean * mean
            var = jnp.maximum(var, 0.0)                              # cancellation guard
            z = (zm - mean) * jax.lax.rsqrt(var + EPS)

        o_ref[b] = z.astype(o_ref.dtype)

    if n_imgs <= 2:
        # tiny batch block: static unroll is fine and gives the scheduler visibility
        for b in range(n_imgs):
            one_image(b)
    else:
        # larger batch block: fori_loop bounds live ranges / vreg pressure
        def body(b, carry):
            one_image(b)
            return carry
        jax.lax.fori_loop(0, n_imgs, body, 0)


def block_unet1_forward(x, conv_w, *, relu=False, bn=True, drop=False, upsample=False,
                        compute_dtype=jnp.bfloat16, out_dtype=None,
                        batch_block=1, cout_block=None):
    """x: (N, Cin, H, W) f32, conv_w: (Cout, Cin, 4, 4) f32 -> (N, Cout, H/2, W/2).

    Returned dtype is `out_dtype` (defaults to `compute_dtype`); pass
    compute_dtype=jnp.float32 for a bit-faithful f32 path.
    """
    if upsample:
        # TODO(synk): ConvTranspose2d (upsample=True) path not implemented in Pallas.
        raise NotImplementedError("upsample=True path not implemented")
    del drop  # nn.Dropout2d is identity at inference; module default is drop=False.

    N, Cin, H, W = x.shape
    Cout = conv_w.shape[0]
    assert H % 2 == 0 and W % 2 == 0, "stride-2 k=4 p=1 path expects even spatial dims"
    Ho, Wo = H // 2, W // 2
    Hq, Wq = Ho + 1, Wo + 1              # space-to-depth grid of the padded input
    R = Hq * Wq                          # rows of the per-image row matrix
    Rp = R + 1                           # +1 zero row so the (Wq+1)-shifted view fits
    Rz = Ho * Wq                         # full output rows (wq==Wo column is junk)
    C4 = 4 * Cin
    S = Ho * Wo                          # valid spatial positions per image

    if out_dtype is None:
        out_dtype = compute_dtype
    if cout_block is None:
        cout_block = Cout
    assert Cout % cout_block == 0
    # (8,128) layout rule: block last dim must equal the full dim or be 128-aligned.
    assert cout_block == Cout or cout_block % 128 == 0

    # ---- wrapper: activation fused into the single layout pass (pad + s2d + cast) ----
    # relu(0) == leaky_relu(0) == 0, so applying before zero-padding matches PyTorch.
    if relu:
        xa = jnp.maximum(x, 0.0)
    else:
        xa = jnp.where(x >= 0.0, x, LEAKY_SLOPE * x)

    # zero-pad + space-to-depth: xp[cin, 2hq+ph, 2wq+pw] -> xs[(hq,wq), (ph,pw,cin)]
    xp = jnp.pad(xa, ((0, 0), (0, 0), (PAD, PAD), (PAD, PAD)))
    xs = xp.reshape(N, Cin, Hq, 2, Wq, 2)
    xs = xs.transpose(0, 2, 4, 3, 5, 1).reshape(N, R, C4).astype(compute_dtype)

    # batch padding so the grid divides evenly (zero images -> zero output; discarded)
    NB = batch_block
    n_blocks = pl.cdiv(N, NB)
    Npad = n_blocks * NB
    # single pad: batch padding + one extra zero row per image (makes Rp rows)
    xs = jnp.pad(xs, ((0, Npad - N), (0, 1), (0, 0)))

    # weights: (Cout, Cin, kh, kw) -> (tap=(dh,dw), c4=(ph,pw,cin), cout); kh=2dh+ph
    wt = conv_w.reshape(Cout, Cin, 2, 2, 2, 2)
    wt = wt.transpose(2, 4, 3, 5, 1, 0).reshape(4, C4, Cout).astype(compute_dtype)

    # row-validity mask over the Rz output rows (tiny resident operand, fetched once)
    q = jnp.arange(Rz)
    mask = ((q % Wq) < Wo).astype(jnp.float32).reshape(Rz, 1)

    # ---- explicit VMEM budget (double-buffered operands + f32 compute slack) ----
    in_b = jnp.dtype(compute_dtype).itemsize
    out_b = jnp.dtype(out_dtype).itemsize
    vmem_est = (2 * NB * Rp * C4 * in_b                 # x blocks (double-buffered)
                + 2 * NB * Rz * cout_block * out_b      # out blocks
                + 2 * 4 * C4 * cout_block * in_b        # weight blocks
                + 4 * Rz * max(cout_block, 128) * 4)    # f32 temporaries slack
    vmem_limit = None
    if vmem_est > (8 << 20):
        # cap well below v7x's 64 MiB physical VMEM; v5e/v6e have 128 MiB physical
        vmem_limit = min(56 << 20, int(1.5 * vmem_est) + (4 << 20))

    kernel = functools.partial(_block_unet1_kernel, bn=bn, n_imgs=NB, wq=Wq, s=S)
    out_flat = pl.pallas_call(
        kernel,
        out_shape=jax.ShapeDtypeStruct((Npad, Rz, Cout), out_dtype),
        grid_spec=pltpu.PrefetchScalarGridSpec(
            num_scalar_prefetch=0,
            # j (cout split) is the inner axis: the x block index (n,0,0) is unchanged
            # across j, so x is NOT re-DMA'd per cout block.
            grid=(n_blocks, Cout // cout_block),
            in_specs=[
                pl.BlockSpec((4, C4, cout_block), lambda n, j: (0, 0, j)),  # weights
                pl.BlockSpec((Rz, 1), lambda n, j: (0, 0)),                 # row mask
                pl.BlockSpec((NB, Rp, C4), lambda n, j: (n, 0, 0)),         # input rows
            ],
            out_specs=pl.BlockSpec((NB, Rz, cout_block), lambda n, j: (n, 0, j)),
        ),
        compiler_params=pltpu.CompilerParams(
            dimension_semantics=("parallel", "parallel"),
            vmem_limit_bytes=vmem_limit),
    )(wt, mask, xs)

    # epilogue: drop padded batch images and the wq==Wo junk column; no pad copy.
    out = out_flat[:N].reshape(N, Ho, Wq, Cout)[:, :, :Wo, :]
    # NCHW to match the PyTorch module.  When chaining BlockUNet layers, keep the
    # (N, Ho, Wo, Cout) view instead and skip this transpose.
    return out.transpose(0, 3, 1, 2)


if __name__ == "__main__":
    key = jax.random.PRNGKey(0)
    kx, kw = jax.random.split(key)

    N, Cin, Cout, H, W = 2, 4, 8, 16, 16
    x = jax.random.normal(kx, (N, Cin, H, W), dtype=jnp.float32)

    # Deterministic synthetic weights (PyTorch Conv2d-style uniform init bound).
    fan_in = Cin * KH * KW
    bound = 1.0 / (fan_in ** 0.5)
    conv_w = jax.random.uniform(kw, (Cout, Cin, KH, KW), jnp.float32, -bound, bound)

    # Pure-JAX reference of the exact PyTorch semantics (default config).
    y_act = jnp.where(x >= 0.0, x, LEAKY_SLOPE * x)
    ref = jax.lax.conv_general_dilated(
        y_act, conv_w, (STRIDE, STRIDE), ((PAD, PAD), (PAD, PAD)),
        dimension_numbers=("NCHW", "OIHW", "NCHW"))
    mean = ref.mean(axis=(2, 3), keepdims=True)
    var = ref.var(axis=(2, 3), keepdims=True)          # biased, like InstanceNorm2d
    ref = (ref - mean) * jax.lax.rsqrt(var + EPS)

    # f32 path: faithful-semantics check.
    out32 = block_unet1_forward(x, conv_w, compute_dtype=jnp.float32)
    out32 = jax.block_until_ready(out32)
    assert out32.shape == (N, Cout, H // 2, W // 2)
    assert out32.dtype == jnp.float32
    assert jnp.allclose(out32, ref, atol=1e-3, rtol=1e-3), float(jnp.max(jnp.abs(out32 - ref)))

    # bf16 fast path (default): bf16 stream + bf16 store, f32 MXU accumulation/stats.
    out16 = block_unet1_forward(x, conv_w)
    out16 = jax.block_until_ready(out16)
    o16 = out16.astype(jnp.float32)
    assert jnp.allclose(o16, ref, atol=5e-2, rtol=5e-2), float(jnp.max(jnp.abs(o16 - ref)))

    # Batched grid step (static-unroll image loop).
    outb = block_unet1_forward(x, conv_w, batch_block=2)
    outb = jax.block_until_ready(outb)
    ob = outb.astype(jnp.float32)
    assert jnp.allclose(ob, ref, atol=5e-2, rtol=5e-2), float(jnp.max(jnp.abs(ob - ref)))

    # batch_block > 2: exercises the fori_loop image loop + zero-image batch padding.
    outf = block_unet1_forward(x, conv_w, batch_block=3)
    outf = jax.block_until_ready(outf)
    of = outf.astype(jnp.float32)
    assert jnp.allclose(of, ref, atol=5e-2, rtol=5e-2), float(jnp.max(jnp.abs(of - ref)))

    # relu=True, bn=False branch (conv-only path, f32).
    ref_rnb = jax.lax.conv_general_dilated(
        jnp.maximum(x, 0.0), conv_w, (STRIDE, STRIDE), ((PAD, PAD), (PAD, PAD)),
        dimension_numbers=("NCHW", "OIHW", "NCHW"))
    out_rnb = block_unet1_forward(x, conv_w, relu=True, bn=False,
                                  compute_dtype=jnp.float32)
    out_rnb = jax.block_until_ready(out_rnb)
    assert jnp.allclose(out_rnb, ref_rnb, atol=1e-3, rtol=1e-3), \
        float(jnp.max(jnp.abs(out_rnb - ref_rnb)))

    print("KERNEL_OK")
</pallas_src>

<mosaic_0001>
module attributes {stable_mosaic.version = 11 : i64} {
  func.func @_block_unet1_kernel(%arg0: i32, %arg1: i32, %arg2: memref<4x16x8xf32, #tpu.memory_space<vmem>>, %arg3: memref<72x1xf32, #tpu.memory_space<vmem>>, %arg4: memref<1x82x16xf32, #tpu.memory_space<vmem>>, %arg5: memref<1x72x8xf32, #tpu.memory_space<vmem>>) attributes {dimension_semantics = [#tpu.dimension_semantics<parallel>, #tpu.dimension_semantics<parallel>], iteration_bounds = array<i64: 2, 1>, scalar_prefetch = 0 : i64, scratch_operands = 0 : i64, tpu.core_type = #tpu.core_type<tc>, window_params = [{transform_indices = @transform_0, window_bounds = array<i64: 4, 16, 8>}, {pipeline_mode = #tpu.pipeline_mode<synchronous>, transform_indices = @transform_1, window_bounds = array<i64: 72, 1>}, {transform_indices = @transform_2, window_bounds = array<i64: 1, 82, 16>}, {transform_indices = @transform_3, window_bounds = array<i64: 1, 72, 8>}]} {
    %c0 = arith.constant 0 : index
    %c0_0 = arith.constant 0 : index
    %0 = vector.load %arg3[%c0, %c0_0] : memref<72x1xf32, #tpu.memory_space<vmem>>, vector<72x1xf32>
    %c0_1 = arith.constant 0 : index
    %c0_2 = arith.constant 0 : index
    %c0_3 = arith.constant 0 : index
    %1 = vector.load %arg4[%c0_1, %c0_2, %c0_3] : memref<1x82x16xf32, #tpu.memory_space<vmem>>, vector<1x72x16xf32>
    %2 = vector.shape_cast %1 : vector<1x72x16xf32> to vector<72x16xf32>
    %c0_4 = arith.constant 0 : index
    %c0_5 = arith.constant 0 : index
    %c0_6 = arith.constant 0 : index
    %3 = vector.load %arg2[%c0_4, %c0_5, %c0_6] : memref<4x16x8xf32, #tpu.memory_space<vmem>>, vector<1x16x8xf32>
    %4 = vector.shape_cast %3 : vector<1x16x8xf32> to vector<16x8xf32>
    %cst = arith.constant dense<0.000000e+00> : vector<72x8xf32>
    %5 = tpu.matmul %2, %4, %cst {dimension_numbers = #tpu.dot_dimension_numbers<[1], [0], [0], [1], [0, 0, 1, 1], [], []>} : vector<72x16xf32>, vector<16x8xf32>, vector<72x8xf32> -> vector<72x8xf32>
    %c0_7 = arith.constant 0 : index
    %c1 = arith.constant 1 : index
    %c0_8 = arith.constant 0 : index
    %6 = vector.load %arg4[%c0_7, %c1, %c0_8] : memref<1x82x16xf32, #tpu.memory_space<vmem>>, vector<1x72x16xf32>
    %7 = vector.shape_cast %6 : vector<1x72x16xf32> to vector<72x16xf32>
    %c1_9 = arith.constant 1 : index
    %c0_10 = arith.constant 0 : index
    %c0_11 = arith.constant 0 : index
    %8 = vector.load %arg2[%c1_9, %c0_10, %c0_11] : memref<4x16x8xf32, #tpu.memory_space<vmem>>, vector<1x16x8xf32>
    %9 = vector.shape_cast %8 : vector<1x16x8xf32> to vector<16x8xf32>
    %cst_12 = arith.constant dense<0.000000e+00> : vector<72x8xf32>
    %10 = tpu.matmul %7, %9, %cst_12 {dimension_numbers = #tpu.dot_dimension_numbers<[1], [0], [0], [1], [0, 0, 1, 1], [], []>} : vector<72x16xf32>, vector<16x8xf32>, vector<72x8xf32> -> vector<72x8xf32>
    %11 = arith.addf %5, %10 : vector<72x8xf32>
    %c0_13 = arith.constant 0 : index
    %c9 = arith.constant 9 : index
    %c0_14 = arith.constant 0 : index
    %12 = vector.load %arg4[%c0_13, %c9, %c0_14] : memref<1x82x16xf32, #tpu.memory_space<vmem>>, vector<1x72x16xf32>
    %13 = vector.shape_cast %12 : vector<1x72x16xf32> to vector<72x16xf32>
    %c2 = arith.constant 2 : index
    %c0_15 = arith.constant 0 : index
    %c0_16 = arith.constant 0 : index
    %14 = vector.load %arg2[%c2, %c0_15, %c0_16] : memref<4x16x8xf32, #tpu.memory_space<vmem>>, vector<1x16x8xf32>
    %15 = vector.shape_cast %14 : vector<1x16x8xf32> to vector<16x8xf32>
    %cst_17 = arith.constant dense<0.000000e+00> : vector<72x8xf32>
    %16 = tpu.matmul %13, %15, %cst_17 {dimension_numbers = #tpu.dot_dimension_numbers<[1], [0], [0], [1], [0, 0, 1, 1], [], []>} : vector<72x16xf32>, vector<16x8xf32>, vector<72x8xf32> -> vector<72x8xf32>
    %17 = arith.addf %11, %16 : vector<72x8xf32>
    %c0_18 = arith.constant 0 : index
    %c10 = arith.constant 10 : index
    %c0_19 = arith.constant 0 : index
    %18 = vector.load %arg4[%c0_18, %c10, %c0_19] : memref<1x82x16xf32, #tpu.memory_space<vmem>>, vector<1x72x16xf32>
    %19 = vector.shape_cast %18 : vector<1x72x16xf32> to vector<72x16xf32>
    %c3 = arith.constant 3 : index
    %c0_20 = arith.constant 0 : index
    %c0_21 = arith.constant 0 : index
    %20 = vector.load %arg2[%c3, %c0_20, %c0_21] : memref<4x16x8xf32, #tpu.memory_space<vmem>>, vector<1x16x8xf32>
    %21 = vector.shape_cast %20 : vector<1x16x8xf32> to vector<16x8xf32>
    %cst_22 = arith.constant dense<0.000000e+00> : vector<72x8xf32>
    %22 = tpu.matmul %19, %21, %cst_22 {dimension_numbers = #tpu.dot_dimension_numbers<[1], [0], [0], [1], [0, 0, 1, 1], [], []>} : vector<72x16xf32>, vector<16x8xf32>, vector<72x8xf32> -> vector<72x8xf32>
    %23 = arith.addf %17, %22 : vector<72x8xf32>
    %24 = vector.broadcast %0 : vector<72x1xf32> to vector<72x8xf32>
    %25 = arith.mulf %23, %24 : vector<72x8xf32>
    %cst_23 = arith.constant dense<0.000000e+00> : vector<8xf32>
    %26 = vector.multi_reduction <add>, %25, %cst_23 [0] : vector<72x8xf32> to vector<8xf32>
    %27 = vector.shape_cast %26 : vector<8xf32> to vector<1x8xf32>
    %cst_24 = arith.constant 1.562500e-02 : f32
    %28 = vector.broadcast %cst_24 : f32 to vector<1x8xf32>
    %29 = arith.mulf %27, %28 : vector<1x8xf32>
    %30 = arith.mulf %25, %25 : vector<72x8xf32>
    %cst_25 = arith.constant dense<0.000000e+00> : vector<8xf32>
    %31 = vector.multi_reduction <add>, %30, %cst_25 [0] : vector<72x8xf32> to vector<8xf32>
    %32 = vector.shape_cast %31 : vector<8xf32> to vector<1x8xf32>
    %cst_26 = arith.constant 1.562500e-02 : f32
    %33 = vector.broadcast %cst_26 : f32 to vector<1x8xf32>
    %34 = arith.mulf %32, %33 : vector<1x8xf32>
    %35 = arith.mulf %29, %29 : vector<1x8xf32>
    %36 = arith.subf %34, %35 : vector<1x8xf32>
    %cst_27 = arith.constant 0.000000e+00 : f32
    %37 = vector.broadcast %cst_27 : f32 to vector<1x8xf32>
    %38 = arith.maximumf %36, %37 : vector<1x8xf32>
    %39 = vector.broadcast %29 : vector<1x8xf32> to vector<72x8xf32>
    %40 = arith.subf %25, %39 : vector<72x8xf32>
    %cst_28 = arith.constant 9.99999974E-6 : f32
    %41 = vector.broadcast %cst_28 : f32 to vector<1x8xf32>
    %42 = arith.addf %38, %41 : vector<1x8xf32>
    %43 = math.rsqrt %42 : vector<1x8xf32>
    %44 = vector.broadcast %43 : vector<1x8xf32> to vector<72x8xf32>
    %45 = arith.mulf %40, %44 : vector<72x8xf32>
    %c0_29 = arith.constant 0 : index
    %c0_30 = arith.constant 0 : index
    %c0_31 = arith.constant 0 : index
    %46 = vector.load %arg5[%c0_29, %c0_30, %c0_31] : memref<1x72x8xf32, #tpu.memory_space<vmem>>, vector<1x72x8xf32>
    %47 = vector.shape_cast %46 : vector<1x72x8xf32> to vector<72x8xf32>
    %48 = vector.shape_cast %45 : vector<72x8xf32> to vector<1x72x8xf32>
    tpu.vector_store %arg5[%c0_29, %c0_30, %c0_31], %48 {strides = array<i32>} : memref<1x72x8xf32, #tpu.memory_space<vmem>>, vector<1x72x8xf32>,
    return
  }
  func.func @transform_0(%arg0: i32, %arg1: i32) -> (i32, i32, i32) {
    %c0_i32 = arith.constant 0 : i32
    %c0_i32_0 = arith.constant 0 : i32
    %c0_i32_1 = arith.constant 0 : i32
    return %c0_i32, %c0_i32_0, %arg1 : i32, i32, i32
  }
  func.func @transform_1(%arg0: i32, %arg1: i32) -> (i32, i32) {
    %c0_i32 = arith.constant 0 : i32
    %c0_i32_0 = arith.constant 0 : i32
    %c0_i32_1 = arith.constant 0 : i32
    return %c0_i32, %c0_i32_0 : i32, i32
  }
  func.func @transform_2(%arg0: i32, %arg1: i32) -> (i32, i32, i32) {
    %c0_i32 = arith.constant 0 : i32
    %c0_i32_0 = arith.constant 0 : i32
    %c0_i32_1 = arith.constant 0 : i32
    return %arg0, %c0_i32, %c0_i32_0 : i32, i32, i32
  }
  func.func @transform_3(%arg0: i32, %arg1: i32) -> (i32, i32, i32) {
    %c0_i32 = arith.constant 0 : i32
    %c0_i32_0 = arith.constant 0 : i32
    return %arg0, %c0_i32, %arg1 : i32, i32, i32
  }
}

</mosaic_0001>

<bundles_post_ra>
// kernel: tpu_custom_call.1
= control target key start
LH: loop header
LB: loop body
LE: loop exit
PB: predicated region body
PF: predicated region fallthrough
CT: control target
= control target key end

     0   :  { %s1368_s12 = smov 0   ;;  %s1370_s13 = smov 0   ;;  %s1691_s0 = inlined_call_operand.vmem [shape: f32[4,16,8], index: 0, kind: input, shape index: {}]   ;;  %s1692_s1 = inlined_call_operand.vmem [shape: f32[72,1], index: 1, kind: input, shape index: {}]   ;;  %s1693_s2 = inlined_call_operand.vmem [shape: f32[2,82,16], index: 2, kind: input, shape index: {}]   ;;  %s1694_s3 = inlined_call_operand.vmem [shape: f32[2,72,8], index: 3, kind: output, shape index: {}]  }
   0x1   :  { %s1372_s14 = smov 0  }
   0x2 LB: > { %s25_s15 = sadd.s32 1, %s1339_s13  ;;  %p1073_p0 = scmp.ge.s32.totalorder %s1343_s14, 1  ;;  %s1343_s14 = sphi %s1372_s14, %s13_s14   ;;  %s1339_s13 = sphi %s1370_s13, %s1696_s13   ;;  %s1335_s12 = sphi %s1368_s12, %s1695_s12  }
   0x3   : > { %p27_p1 = scmp.ge.s32.totalorder %s25_s15, 2  ;;  %p160_p2 = scmp.lt.s32.totalorder %s1343_s14, 3 }
   0x5   : > { %s1698_s15 = smov (%p27_p1, %s25_s15), 0  ;;  %p161_p3 = pnand %p1073_p0, %p160_p2 }
   0x6   : > { %p195_p4 = scmp.lt.s32.totalorder (!%p161_p3), %s1335_s12, 1 }
   0x7   : > { %164 = sbr.rel (%p161_p3) target bundleno = 333 (0x14d), region = 32 }
   0xc   : > { %v1077_v0 = vld [vmem:[%s1691_s0 + $0x18] sm:$0xff]  ;;  %v227_v1 = vld [vmem:[%s1691_s0 + $0x8] sm:$0xff]  ;;  %v1345_v2 = vmov 0.0   ;;  %v1076_v3 = vld [vmem:[%s1691_s0 + $0x10] sm:$0xff]  ;;  %s1700_s12 = smov (!%p195_p4, %s1335_s12), 1  ;;  %vm1346_vm0 = vmmov 0  }
   0xd   : > { %1164 = vmatprep.subr.mxu0 %v1345_v2  ;;  %1195 = vmatprep.subr.mxu1 %v1345_v2  ;;  %v226_v4 = vld [vmem:[%s1691_s0] sm:$0xff]  ;;  %s1288_s24 = smul.u32 88, %s1700_s12  ;;  %vm240_vm1 = vcmask 130048   ;;  %v1097_v5 = vld [vmem:[%s1691_s0 + $0x28] sm:$0xff]  ;;  %v1108_v6 = vld [vmem:[%s1691_s0 + $0x38] sm:$0xff]  ;;  %v1347_v9 = vmov 0  }
   0xe   : > { %1165 = vmatpush3.msra.mxu0 %v1077_v0  ;;  %1196 = vmatpush3.msra.mxu1 %v227_v1  ;;  %v1096_v12 = vld [vmem:[%s1691_s0 + $0x20] sm:$0xff]  ;;  %v1107_v13 = vld [vmem:[%s1691_s0 + $0x30] sm:$0xff]  ;;  %v209_v18 = vld [vmem:[%s1692_s1 + $0x8] sm:$0xff]  ;;  %vm885_vm2 = vcmask 64512  }
   0xf   : > { %1166 = vmatprep.subr.mxu0 %v1345_v2  ;;  %1197 = vmatprep.subr.mxu1 %v1345_v2  ;;  %s1413_s27 = scalar_lea.vmem %s1693_s2, %s1288_s24  ;;  %v208_v14 = vld [vmem:[%s1692_s1] sm:$0xff]  ;;  %v210_v15 = vld [vmem:[%s1692_s1 + $0x10] sm:$0xff]  ;;  %v211_v19 = vld [vmem:[%s1692_s1 + $0x18] sm:$0xff] }
  0x10   : > { %1167 = vmatpush3.msra.mxu0 %v1076_v3  ;;  %1168 = vmatprep.mubr.msk.f32.mxu0 %vm1346_vm0, %v1345_v2  ;;  %v228_v7 = vld [vmem:[%s1413_s27 + $0x1] sm:$0xff]  ;;  %v1427_v10 = vld [vmem:[%s1413_s27 + $0x9] sm:$0xff]  ;;  %v1456_v16 = vld [vmem:[%s1413_s27 + $0x11] sm:$0xff] }
  0x11   : > { %1198 = vmatpush3.msra.mxu1 %v226_v4  ;;  %1199 = vmatprep.mubr.msk.f32.mxu1 %vm1346_vm0, %v1345_v2  ;;  %v217_v8 = vld [vmem:[%s1413_s27] sm:$0xff]  ;;  %v218_v11 = vld [vmem:[%s1413_s27 + $0x8] sm:$0xff]  ;;  %v219_v17 = vld [vmem:[%s1413_s27 + $0x10] sm:$0xff] }
  0x12   : > { %1226 = vmatprep.subr.mxu0 %v1345_v2  ;;  %1257 = vmatprep.subr.mxu1 %v1345_v2  ;;  %v231_v20 = vld [vmem:[%s1413_s27 + $0x19] sm:$0xff]  ;;  %v213_v23 = vld [vmem:[%s1692_s1 + $0x28] sm:$0xff]  ;;  %v214_v26 = vld [vmem:[%s1692_s1 + $0x30] sm:$0xff] }
  0x13   : > { %1317 = vset.pattern.permute.xlu0 %v1347_v9  ;;  %1318 = vset.pattern.permute.xlu1 %v1347_v9  ;;  %v220_v21 = vld [vmem:[%s1413_s27 + $0x18] sm:$0xff]  ;;  %v212_v22 = vld [vmem:[%s1692_s1 + $0x20] sm:$0xff]  ;;  %v233_v28 = vld [vmem:[%s1413_s27 + $0x29] sm:$0xff] }
  0x14   : > { %1169 = vmatmul.mubr.msk.f32.vlgmr.msra.gmra.mxu0 %vm240_vm1, %v228_v7  ;;  %1200 = vmatmul.mubr.msk.f32.vlgmr.msra.gmra.mxu1 %vm240_vm1, %v217_v8  ;;  %v232_v24 = vld [vmem:[%s1413_s27 + $0x21] sm:$0xff]  ;;  %v215_v27 = vld [vmem:[%s1692_s1 + $0x38] sm:$0xff]  ;;  %v223_v32 = vld [vmem:[%s1413_s27 + $0x30] sm:$0xff] }
  0x15   : > { %1227 = vmatpush3.msra.mxu0 %v1097_v5  ;;  %1258 = vmatpush3.msra.mxu1 %v1108_v6  ;;  %v221_v25 = vld [vmem:[%s1413_s27 + $0x20] sm:$0xff]  ;;  %v222_v29 = vld [vmem:[%s1413_s27 + $0x28] sm:$0xff]  ;;  %v234_v31 = vld [vmem:[%s1413_s27 + $0x31] sm:$0xff] }
  0x16   : > { %1171 = vmatprep.mubr.msk.f32.mxu0 %vm1346_vm0, %v1345_v2  ;;  %1202 = vmatprep.mubr.msk.f32.mxu1 %vm1346_vm0, %v1345_v2  ;;  %v216_v30 = vld [vmem:[%s1692_s1 + $0x40] sm:$0xff]  ;;  %v224_v34 = vld [vmem:[%s1413_s27 + $0x38] sm:$0xff]  ;;  %v673_v37 = vld [vmem:[%s1413_s27 + $0xa] sm:$0xff] }
  0x17   : > { %1228 = vmatprep.subr.mxu0 %v1345_v2  ;;  %1259 = vmatprep.subr.mxu1 %v1345_v2  ;;  %v235_v33 = vld [vmem:[%s1413_s27 + $0x39] sm:$0xff]  ;;  %v236_v35 = vld [vmem:[%s1413_s27 + $0x41] sm:$0xff]  ;;  %v677_v41 = vld [vmem:[%s1413_s27 + $0x2a] sm:$0xff] }
  0x18   : > { %1172 = vmatmul.mubr.msk.f32.gmra.mxu0 %vm240_vm1, %v1427_v10  ;;  %1203 = vmatmul.mubr.msk.f32.gmra.mxu1 %vm240_vm1, %v218_v11  ;;  %v225_v36 = vld [vmem:[%s1413_s27 + $0x40] sm:$0xff]  ;;  %v674_v38 = vld [vmem:[%s1413_s27 + $0x12] sm:$0xff]  ;;  %v523_v45 = vld [vmem:[%s1413_s27 + $0x49] sm:$0xff] }
  0x19   : > { %1174 = vmatprep.mubr.msk.f32.mxu0 %vm1346_vm0, %v1345_v2  ;;  %1205 = vmatprep.mubr.msk.f32.mxu1 %vm1346_vm0, %v1345_v2  ;;  %v675_v39 = vld [vmem:[%s1413_s27 + $0x1a] sm:$0xff]  ;;  %v676_v40 = vld [vmem:[%s1413_s27 + $0x22] sm:$0xff]  ;;  %v678_v42 = vld [vmem:[%s1413_s27 + $0x32] sm:$0xff] }
  0x1a   : > { %1229 = vmatpush3.msra.mxu0 %v1096_v12  ;;  %1260 = vmatpush3.msra.mxu1 %v1107_v13  ;;  %v679_v43 = vld [vmem:[%s1413_s27 + $0x3a] sm:$0xff]  ;;  %v680_v44 = vld [vmem:[%s1413_s27 + $0x42] sm:$0xff]  ;;  %v681_v46 = vld [vmem:[%s1413_s27 + $0x4a] sm:$0xff]  ;;  %s1289_s27 = smul.u32 72, %s1700_s12 }
  0x1b   : > { %833 = vperm.xlu0 %1317, %v208_v14   ;;  %843 = vperm.xlu1 %1318, %v210_v15  }
  0x1c   : > { %1175 = vmatmul.mubr.msk.f32.gmra.mxu0 %vm240_vm1, %v1456_v16  ;;  %1206 = vmatmul.mubr.msk.f32.gmra.mxu1 %vm240_vm1, %v219_v17  ;;  %s207_s7 = scalar_lea.vmem %s1694_s3, %s1289_s27 }
  0x1d   : > { %1177 = vmatprep.mubr.msk.f32.mxu0 %vm1346_vm0, %v1345_v2  ;;  %1208 = vmatprep.mubr.msk.f32.mxu1 %vm1346_vm0, %v1345_v2 }
  0x1f   : > { %838 = vperm.xlu0 %1317, %v209_v18   ;;  %848 = vperm.xlu1 %1318, %v211_v19  }
  0x20   : > { %1178 = vmatmul.mubr.msk.f32.gmra.mxu0 %vm240_vm1, %v231_v20  ;;  %1209 = vmatmul.mubr.msk.f32.gmra.mxu1 %vm240_vm1, %v220_v21 }
  0x21   : > { %1180 = vmatprep.mubr.msk.f32.mxu0 %vm1346_vm0, %v1345_v2  ;;  %1211 = vmatprep.mubr.msk.f32.mxu1 %vm1346_vm0, %v1345_v2 }
  0x23   : > { %853 = vperm.xlu0 %1317, %v212_v22   ;;  %858 = vperm.xlu1 %1318, %v213_v23  }
  0x24   : > { %1181 = vmatmul.mubr.msk.f32.gmra.mxu0 %vm240_vm1, %v232_v24  ;;  %1212 = vmatmul.mubr.msk.f32.gmra.mxu1 %vm240_vm1, %v221_v25 }
  0x25   : > { %1183 = vmatprep.mubr.msk.f32.mxu0 %vm1346_vm0, %v1345_v2  ;;  %1214 = vmatprep.mubr.msk.f32.mxu1 %vm1346_vm0, %v1345_v2 }
  0x27   : > { %863 = vperm.xlu0 %1317, %v214_v26   ;;  %868 = vperm.xlu1 %1318, %v215_v27  }
  0x28   : > { %1184 = vmatmul.mubr.msk.f32.gmra.mxu0 %vm240_vm1, %v233_v28  ;;  %1215 = vmatmul.mubr.msk.f32.gmra.mxu1 %vm240_vm1, %v222_v29 }
  0x29   : > { %1186 = vmatprep.mubr.msk.f32.mxu0 %vm1346_vm0, %v1345_v2  ;;  %1217 = vmatprep.mubr.msk.f32.mxu1 %vm1346_vm0, %v1345_v2 }
  0x2b   : > { %873 = vperm.xlu0 %1317, %v216_v30  }
  0x2c   : > { %1187 = vmatmul.mubr.msk.f32.gmra.mxu0 %vm240_vm1, %v234_v31  ;;  %1218 = vmatmul.mubr.msk.f32.gmra.mxu1 %vm240_vm1, %v223_v32 }
  0x2d   : > { %1189 = vmatprep.mubr.msk.f32.mxu0 %vm1346_vm0, %v1345_v2  ;;  %1220 = vmatprep.mubr.msk.f32.mxu1 %vm1346_vm0, %v1345_v2 }
  0x30   : > { %1190 = vmatmul.mubr.msk.f32.gmra.mxu0 %vm240_vm1, %v235_v33  ;;  %1221 = vmatmul.mubr.msk.f32.gmra.mxu1 %vm240_vm1, %v224_v34 }
  0x31   : > { %1192 = vmatprep.mubr.msk.f32.mxu0 %vm1346_vm0, %v1345_v2  ;;  %1223 = vmatprep.mubr.msk.f32.mxu1 %vm1346_vm0, %v1345_v2 }
  0x34   : > { %1193 = vmatmul.mubr.msk.f32.gmra.mxu0 %vm240_vm1, %v236_v35  ;;  %1224 = vmatmul.mubr.msk.f32.gmra.mxu1 %vm240_vm1, %v225_v36 }
  0x35   : > { %1230 = vmatprep.mubr.msk.f32.mxu0 %vm1346_vm0, %v1345_v2  ;;  %1261 = vmatprep.mubr.msk.f32.mxu1 %vm1346_vm0, %v1345_v2 }
  0x38   : > { %1231 = vmatmul.mubr.msk.f32.vlgmr.msra.gmra.mxu0 %vm240_vm1, %v1427_v10  ;;  %1262 = vmatmul.mubr.msk.f32.vlgmr.msra.gmra.mxu1 %vm240_vm1, %v673_v37 }
  0x39   : > { %1233 = vmatprep.mubr.msk.f32.mxu0 %vm1346_vm0, %v1345_v2  ;;  %1264 = vmatprep.mubr.msk.f32.mxu1 %vm1346_vm0, %v1345_v2 }
  0x3c   : > { %1234 = vmatmul.mubr.msk.f32.gmra.mxu0 %vm240_vm1, %v1456_v16  ;;  %1265 = vmatmul.mubr.msk.f32.gmra.mxu1 %vm240_vm1, %v674_v38 }
  0x3d   : > { %1236 = vmatprep.mubr.msk.f32.mxu0 %vm1346_vm0, %v1345_v2  ;;  %1267 = vmatprep.mubr.msk.f32.mxu1 %vm1346_vm0, %v1345_v2 }
  0x40   : > { %1237 = vmatmul.mubr.msk.f32.gmra.mxu0 %vm240_vm1, %v231_v20  ;;  %1268 = vmatmul.mubr.msk.f32.gmra.mxu1 %vm240_vm1, %v675_v39 }
  0x41   : > { %1239 = vmatprep.mubr.msk.f32.mxu0 %vm1346_vm0, %v1345_v2  ;;  %1270 = vmatprep.mubr.msk.f32.mxu1 %vm1346_vm0, %v1345_v2 }
  0x44   : > { %1240 = vmatmul.mubr.msk.f32.gmra.mxu0 %vm240_vm1, %v232_v24  ;;  %1271 = vmatmul.mubr.msk.f32.gmra.mxu1 %vm240_vm1, %v676_v40 }
  0x45   : > { %1242 = vmatprep.mubr.msk.f32.mxu0 %vm1346_vm0, %v1345_v2  ;;  %1273 = vmatprep.mubr.msk.f32.mxu1 %vm1346_vm0, %v1345_v2 }
  0x48   : > { %1243 = vmatmul.mubr.msk.f32.gmra.mxu0 %vm240_vm1, %v233_v28  ;;  %1274 = vmatmul.mubr.msk.f32.gmra.mxu1 %vm240_vm1, %v677_v41 }
  0x49   : > { %1245 = vmatprep.mubr.msk.f32.mxu0 %vm1346_vm0, %v1345_v2  ;;  %1276 = vmatprep.mubr.msk.f32.mxu1 %vm1346_vm0, %v1345_v2 }
  0x4c   : > { %1246 = vmatmul.mubr.msk.f32.gmra.mxu0 %vm240_vm1, %v234_v31  ;;  %1277 = vmatmul.mubr.msk.f32.gmra.mxu1 %vm240_vm1, %v678_v42 }
  0x4d   : > { %1248 = vmatprep.mubr.msk.f32.mxu0 %vm1346_vm0, %v1345_v2  ;;  %1279 = vmatprep.mubr.msk.f32.mxu1 %vm1346_vm0, %v1345_v2 }
  0x50   : > { %1249 = vmatmul.mubr.msk.f32.gmra.mxu0 %vm240_vm1, %v235_v33  ;;  %1280 = vmatmul.mubr.msk.f32.gmra.mxu1 %vm240_vm1, %v679_v43 }
  0x51   : > { %1251 = vmatprep.mubr.msk.f32.mxu0 %vm1346_vm0, %v1345_v2  ;;  %1282 = vmatprep.mubr.msk.f32.mxu1 %vm1346_vm0, %v1345_v2 }
  0x54   : > { %1252 = vmatmul.mubr.msk.f32.gmra.mxu0 %vm240_vm1, %v236_v35  ;;  %1283 = vmatmul.mubr.msk.f32.gmra.mxu1 %vm240_vm1, %v680_v44 }
  0x55   : > { %1254 = vmatprep.mubr.msk.f32.mxu0 %vm1346_vm0, %v1345_v2  ;;  %1285 = vmatprep.mubr.msk.f32.mxu1 %vm1346_vm0, %v1345_v2 }
  0x58   : > { %1255 = vmatmul.mubr.msk.f32.gmra.mxu0 %vm240_vm1, %v523_v45  ;;  %1286 = vmatmul.mubr.msk.f32.gmra.mxu1 %vm240_vm1, %v681_v46 }
  0x96   : > { %v834_v32 = vpop.permute.xlu0 %833  ;;  %v844_v39 = vpop.permute.xlu1 %843 }
  0xd4   : > { %v334_v47 = vpop.f32.mrf.mxu0  ;;  %v471_v48 = vpop.f32.mrf.mxu1 }
  0xd5   : > { %v472_v28 = vadd.f32 %v471_v48, %v334_v47  ;;  %v839_v47 = vpop.permute.xlu0 %838 }
  0xd6   : > { %v1170_v49 = vpop.f32.mrf.mxu0  ;;  %v1201_v50 = vpop.f32.mrf.mxu1 }
  0xd8   : > { %v339_v51 = vpop.f32.mrf.mxu0  ;;  %v476_v52 = vpop.f32.mrf.mxu1 }
  0xd9   : > { %v477_v27 = vadd.f32 %v476_v52, %v339_v51 }
  0xda   : > { %v1173_v53 = vpop.f32.mrf.mxu0  ;;  %v1204_v54 = vpop.f32.mrf.mxu1 }
  0xdb   : > { %v849_v54 = vpop.permute.xlu1 %848 }
  0xdc   : > { %v344_v55 = vpop.f32.mrf.mxu0  ;;  %v481_v56 = vpop.f32.mrf.mxu1 }
  0xdd   : > { %v482_v31 = vadd.f32 %v481_v56, %v344_v55 }
  0xde   : > { %v1176_v57 = vpop.f32.mrf.mxu0  ;;  %v1207_v58 = vpop.f32.mrf.mxu1 }
  0xe0   : > { %v349_v59 = vpop.f32.mrf.mxu0  ;;  %v486_v60 = vpop.f32.mrf.mxu1 }
  0xe1   : > { %v487_v37 = vadd.f32 %v486_v60, %v349_v59 }
  0xe2   : > { %v1179_v61 = vpop.f32.mrf.mxu0  ;;  %v1210_v62 = vpop.f32.mrf.mxu1 }
  0xe4   : > { %v354_v63 = vpop.f32.mrf.mxu0  ;;  %v491_v0 = vpop.f32.mrf.mxu1 }
  0xe5   : > { %v492_v49 = vadd.f32 %v491_v0, %v354_v63 }
  0xe6   : > { %v1182_v1 = vpop.f32.mrf.mxu0  ;;  %v1213_v2 = vpop.f32.mrf.mxu1 }
  0xe7   : > { %v854_v2 = vpop.permute.xlu0 %853 }
  0xe8   : > { %v359_v3 = vpop.f32.mrf.mxu0  ;;  %v496_v4 = vpop.f32.mrf.mxu1 }
  0xe9   : > { %v497_v59 = vadd.f32 %v496_v4, %v359_v3 }
  0xea   : > { %v1185_v5 = vpop.f32.mrf.mxu0  ;;  %v1216_v6 = vpop.f32.mrf.mxu1 }
  0xec   : > { %v364_v7 = vpop.f32.mrf.mxu0  ;;  %v501_v8 = vpop.f32.mrf.mxu1 }
  0xed   : > { %v502_v6 = vadd.f32 %v501_v8, %v364_v7 }
  0xee   : > { %v1188_v9 = vpop.f32.mrf.mxu0  ;;  %v1219_v10 = vpop.f32.mrf.mxu1 }
  0xf0   : > { %v1597_v11 = vpop.f32.mrf.mxu0  ;;  %v1599_v12 = vpop.f32.mrf.mxu1 }
  0xf2   : > { %v1191_v13 = vpop.f32.mrf.mxu0  ;;  %v1222_v14 = vpop.f32.mrf.mxu1 }
  0xf4   : > { %v1601_v15 = vpop.f32.mrf.mxu0  ;;  %v1603_v16 = vpop.f32.mrf.mxu1 }
  0xf6   : > { %v1194_v17 = vpop.f32.mrf.mxu0  ;;  %v1225_v18 = vpop.f32.mrf.mxu1 }
  0xf7   : > { %v859_v17 = vpop.permute.xlu1 %858 }
  0xf8   : > { %v620_v19 = vpop.f32.mrf.mxu0  ;;  %v778_v20 = vpop.f32.mrf.mxu1 }
  0xf9   : > { %v664_v34 = vadd.f32 %v620_v19, %v472_v28 }
  0xfa   : > { %v1232_v21 = vpop.f32.mrf.mxu0  ;;  %v1263_v22 = vpop.f32.mrf.mxu1 }
  0xfb   : > { %v822_v44 = vadd.f32 %v778_v20, %v664_v34 }
  0xfc   : > { %v625_v23 = vpop.f32.mrf.mxu0  ;;  %v783_v24 = vpop.f32.mrf.mxu1 }
  0xfd   : > { %v665_v33 = vadd.f32 %v625_v23, %v477_v27  ;;  %v1607_v56 = vmul.f32 %v834_v32, %v822_v44  ;;  %v864_v32 = vpop.permute.xlu0 %863 }
  0xfe   : > { %v1235_v25 = vpop.f32.mrf.mxu0  ;;  %v1266_v26 = vpop.f32.mrf.mxu1 }
  0xff   : > { %v823_v42 = vadd.f32 %v783_v24, %v665_v33  ;;  %v910_v9 = vmul.f32 %v1607_v56, %v1607_v56  ;;  %v886_v19 = vsel %vm885_vm2, %v1607_v56, 0.0  ;;  %v507_v25 = vadd.f32 %v1599_v12, %v1597_v11 }
 0x100   : > { %v630_v29 = vpop.f32.mrf.mxu0  ;;  %v788_v30 = vpop.f32.mrf.mxu1 }
 0x101   : > { %v666_v38 = vadd.f32 %v630_v29, %v482_v31  ;;  %v1605_v53 = vmul.f32 %v839_v47, %v823_v42  ;;  %v919_v26 = vsel %vm885_vm2, %v910_v9, 0.0  ;;  %v512_v42 = vadd.f32 %v1603_v16, %v1601_v15 }
 0x102   : > { %v1238_v35 = vpop.f32.mrf.mxu0  ;;  %v1269_v36 = vpop.f32.mrf.mxu1 }
 0x103   : > { %v824_v48 = vadd.f32 %v788_v30, %v666_v38  ;;  %v911_v1 = vmul.f32 %v1605_v53, %v1605_v53  ;;  %v887_v3 = vsel %vm885_vm2, %v1605_v53, 0.0 }
 0x104   : > { %v635_v40 = vpop.f32.mrf.mxu0  ;;  %v793_v41 = vpop.f32.mrf.mxu1  ;;  %v888_v27 = vadd.f32 %v887_v3, %v886_v19 }
 0x105   : > { %v667_v43 = vadd.f32 %v635_v40, %v487_v37  ;;  %v1609_v60 = vmul.f32 %v844_v39, %v824_v48  ;;  %v920_v21 = vsel %vm885_vm2, %v911_v1, 0.0  ;;  %v869_v48 = vpop.permute.xlu1 %868 }
 0x106   : > { %v1241_v45 = vpop.f32.mrf.mxu0  ;;  %v1272_v46 = vpop.f32.mrf.mxu1  ;;  %v921_v35 = vadd.f32 %v920_v21, %v919_v26 }
 0x107   : > { %v825_v50 = vadd.f32 %v793_v41, %v667_v43  ;;  %v912_v4 = vmul.f32 %v1609_v60, %v1609_v60  ;;  %v889_v22 = vsel %vm885_vm2, %v1609_v60, 0.0 }
 0x108   : > { %v640_v51 = vpop.f32.mrf.mxu0  ;;  %v798_v52 = vpop.f32.mrf.mxu1  ;;  %v890_v36 = vadd.f32 %v889_v22, %v888_v27 }
 0x109   : > { %v668_v55 = vadd.f32 %v640_v51, %v492_v49  ;;  %v1611_v62 = vmul.f32 %v849_v54, %v825_v50  ;;  %v922_v30 = vsel %vm885_vm2, %v912_v4, 0.0 }
 0x10a   : > { %v1244_v57 = vpop.f32.mrf.mxu0  ;;  %v1275_v58 = vpop.f32.mrf.mxu1  ;;  %v923_v43 = vadd.f32 %v922_v30, %v921_v35 }
 0x10b   : > { %v826_v61 = vadd.f32 %v798_v52, %v668_v55  ;;  %v913_v7 = vmul.f32 %v1611_v62, %v1611_v62  ;;  %v891_v31 = vsel %vm885_vm2, %v1611_v62, 0.0 }
 0x10c   : > { %v645_v63 = vpop.f32.mrf.mxu0  ;;  %v803_v0 = vpop.f32.mrf.mxu1  ;;  %v892_v44 = vadd.f32 %v891_v31, %v890_v36 }
 0x10d   : > { %v669_v5 = vadd.f32 %v645_v63, %v497_v59  ;;  %v1621_v14 = vmul.f32 %v854_v2, %v826_v61  ;;  %v924_v37 = vsel %vm885_vm2, %v913_v7, 0.0 }
 0x10e   : > { %v1247_v10 = vpop.f32.mrf.mxu0  ;;  %v1278_v13 = vpop.f32.mrf.mxu1  ;;  %v925_v52 = vadd.f32 %v924_v37, %v923_v43 }
 0x10f   : > { %v827_v18 = vadd.f32 %v803_v0, %v669_v5  ;;  %v914_v33 = vmul.f32 %v1621_v14, %v1621_v14  ;;  %v893_v38 = vsel %vm885_vm2, %v1621_v14, 0.0  ;;  %v874_v10 = vpop.permute.xlu0 %873 }
 0x110   : > { %v650_v8 = vpop.f32.mrf.mxu0  ;;  %v808_v20 = vpop.f32.mrf.mxu1  ;;  %v894_v54 = vadd.f32 %v893_v38, %v892_v44 }
 0x111   : > { %v1630_v23 = vmul.f32 %v859_v17, %v827_v18  ;;  %v670_v24 = vadd.f32 %v650_v8, %v502_v6  ;;  %v926_v49 = vsel %vm885_vm2, %v914_v33, 0.0 }
 0x112   : > { %v1250_v28 = vpop.f32.mrf.mxu0  ;;  %v1281_v29 = vpop.f32.mrf.mxu1  ;;  %v927_v61 = vadd.f32 %v926_v49, %v925_v52 }
 0x113   : > { %v828_v34 = vadd.f32 %v808_v20, %v670_v24  ;;  %v915_v39 = vmul.f32 %v1630_v23, %v1630_v23  ;;  %v895_v47 = vsel %vm885_vm2, %v1630_v23, 0.0 }
 0x114   : > { %v655_v11 = vpop.f32.mrf.mxu0  ;;  %v813_v12 = vpop.f32.mrf.mxu1  ;;  %v896_v63 = vadd.f32 %v895_v47, %v894_v54 }
 0x115   : > { %v1645_v40 = vmul.f32 %v864_v32, %v828_v34  ;;  %v671_v41 = vadd.f32 %v655_v11, %v507_v25  ;;  %v928_v15 = vsel %vm885_vm2, %v915_v39, 0.0 }
 0x116   : > { %v1253_v45 = vpop.f32.mrf.mxu0  ;;  %v1284_v46 = vpop.f32.mrf.mxu1  ;;  %v929_v13 = vadd.f32 %v928_v15, %v927_v61 }
 0x117   : > { %v916_v50 = vmul.f32 %v1645_v40, %v1645_v40  ;;  %v829_v51 = vadd.f32 %v813_v12, %v671_v41  ;;  %v897_v16 = vsel %vm885_vm2, %v1645_v40, 0.0 }
 0x118   : > { %v660_v55 = vpop.f32.mrf.mxu0  ;;  %v818_v57 = vpop.f32.mrf.mxu1  ;;  %v898_v3 = vadd.f32 %v897_v16, %v896_v63 }
 0x119   : > { %v883_v58 = vmul.f32 %v869_v48, %v829_v51  ;;  %v672_v59 = vadd.f32 %v660_v55, %v512_v42  ;;  %v930_v2 = vsel %vm885_vm2, %v916_v50, 0.0 }
 0x11a   : > { %v1256_v0 = vpop.f32.mrf.mxu0  ;;  %v1287_v1 = vpop.f32.mrf.mxu1  ;;  %v931_v18 = vadd.f32 %v930_v2, %v929_v13 }
 0x11b   : > { %v899_v5 = vsel %vm885_vm2, %v883_v58, 0.0  ;;  %v917_v6 = vmul.f32 %v883_v58, %v883_v58  ;;  %v830_v9 = vadd.f32 %v818_v57, %v672_v59 }
 0x11c   : > { %v900_v19 = vadd.f32 %v899_v5, %v898_v3 }
 0x11d   : > { %v932_v4 = vsel %vm885_vm2, %v917_v6, 0.0  ;;  %v884_v17 = vmul.f32 %v874_v10, %v830_v9 }
 0x11e   : > { %v933_v20 = vadd.f32 %v932_v4, %v931_v18 }
 0x11f   : > { %v901_v7 = vsel %vm885_vm2, %v884_v17, 0.0  ;;  %v918_v8 = vmul.f32 %v884_v17, %v884_v17 }
 0x120   : > { %v902_v21 = vadd.f32 %v901_v7, %v900_v19 }
 0x121   : > { %v934_v22 = vsel %vm885_vm2, %v918_v8, 0.0 }
 0x122   : > { %v903_v24 = vrot.slane %v902_v21, 4  ;;  %v935_v25 = vadd.f32 %v934_v22, %v933_v20 }
 0x124   : > { %v904_v26 = vadd.f32 %v903_v24, %v902_v21  ;;  %v936_v27 = vrot.slane %v935_v25, 4 }
 0x126   : > { %v905_v28 = vrot.slane %v904_v26, 2  ;;  %v937_v29 = vadd.f32 %v936_v27, %v935_v25 }
 0x128   : > { %v906_v30 = vadd.f32 %v905_v28, %v904_v26  ;;  %v938_v31 = vrot.slane %v937_v29, 2 }
 0x12a   : > { %v907_v32 = vrot.slane %v906_v30, 1  ;;  %v939_v33 = vadd.f32 %v938_v31, %v937_v29 }
 0x12c   : > { %v908_v34 = vadd.f32 %v907_v32, %v906_v30  ;;  %v940_v35 = vrot.slane %v939_v33, 1 }
 0x12e   : > { %v909_v36 = vmul.f32 0.015625, %v908_v34  ;;  %v941_v37 = vadd.f32 %v940_v35, %v939_v33 }
 0x130   : > { %v942_v11 = vmul.f32 0.015625, %v941_v37  ;;  %v943_v12 = vmul.f32 %v909_v36, %v909_v36  ;;  %v946_v42 = vsub.f32 %v1607_v56, %v909_v36  ;;  %v947_v43 = vsub.f32 %v1605_v53, %v909_v36 }
 0x131   : > { %v948_v44 = vsub.f32 %v1609_v60, %v909_v36  ;;  %v949_v45 = vsub.f32 %v1611_v62, %v909_v36  ;;  %v950_v46 = vsub.f32 %v1621_v14, %v909_v36  ;;  %v951_v47 = vsub.f32 %v1630_v23, %v909_v36 }
 0x132   : > { %v944_v38 = vsub.f32 %v942_v11, %v943_v12  ;;  %v952_v48 = vsub.f32 %v1645_v40, %v909_v36  ;;  %v953_v50 = vsub.f32 %v883_v58, %v909_v36  ;;  %v954_v51 = vsub.f32 %v884_v17, %v909_v36 }
 0x134   : > { %v945_v39 = vmax.f32 %v944_v38, 0.0 }
 0x136   : > { %v955_v41 = vadd.f32 1e-05, %v945_v39 }
 0x138   : > { %1319 = vrsqrt.f32 %v955_v41 }
 0x145   : > { %v1320_v49 = vpop.eup %1319 }
 0x146   : > { %v957_v56 = vmul.f32 %v1320_v49, %v946_v42  ;;  %v958_v52 = vmul.f32 %v1320_v49, %v947_v43  ;;  %v959_v53 = vmul.f32 %v1320_v49, %v948_v44  ;;  %v960_v54 = vmul.f32 %v1320_v49, %v949_v45 }
 0x147   : > { %v961_v60 = vmul.f32 %v1320_v49, %v950_v46  ;;  %v962_v55 = vmul.f32 %v1320_v49, %v951_v47  ;;  %v963_v62 = vmul.f32 %v1320_v49, %v952_v48  ;;  %v964_v57 = vmul.f32 %v1320_v49, %v953_v50 }
 0x148   : > { %v965_v14 = vmul.f32 %v1320_v49, %v954_v51  ;;  %966 = vst.msk [vmem:[%s207_s7] sm:$0xff] %vm885_vm2, %v957_v56  ;;  %967 = vst.msk [vmem:[%s207_s7 + $0x8] sm:$0xff] %vm885_vm2, %v958_v52 }
 0x149   : > { %968 = vst.msk [vmem:[%s207_s7 + $0x10] sm:$0xff] %vm885_vm2, %v959_v53  ;;  %969 = vst.msk [vmem:[%s207_s7 + $0x18] sm:$0xff] %vm885_vm2, %v960_v54 }
 0x14a   : > { %970 = vst.msk [vmem:[%s207_s7 + $0x20] sm:$0xff] %vm885_vm2, %v961_v60  ;;  %971 = vst.msk [vmem:[%s207_s7 + $0x28] sm:$0xff] %vm885_vm2, %v962_v55 }
 0x14b   : > { %972 = vst.msk [vmem:[%s207_s7 + $0x30] sm:$0xff] %vm885_vm2, %v963_v62  ;;  %973 = vst.msk [vmem:[%s207_s7 + $0x38] sm:$0xff] %vm885_vm2, %v964_v57 }
 0x14c   : > { %974 = vst.msk [vmem:[%s207_s7 + $0x40] sm:$0xff] %vm885_vm2, %v965_v14 }
 0x14d PF: > { %s13_s14 = sadd.s32 1, %s1343_s14   ;;  %s1695_s12 = smov %s1339_s13 }
 0x14e   : > { %p10_p5 = scmp.ge.s32.totalorder %s13_s14, 4   ;;  %s1696_s13 = smov %s1698_s15 }
 0x150   :  { %12 = sbr.rel (!%p10_p5) target bundleno = 2 (0x2), region = 68 }

</bundles_post_ra>
